<compile_context>
chip_gen: v7x
topology: tpu7x:2x2x1
jax: 0.10.0
libtpu: 0.0.40
codegen_flags: <defaults>
</compile_context>

<pallas_src>
import jax
import jax.numpy as jnp
from jax import lax
from jax.experimental import pallas as pl
from jax.experimental.pallas import tpu as pltpu


def _tag_pooler_kernel(x_ref, wt_ref, b_ref, o_ref):
    # x_ref : (TB, H)   first-token rows
    # wt_ref: (H, TN)   pre-transposed weight slab (in_features, out-feature tile)
    # b_ref : (1, TN)   bias slab
    # o_ref : (TB, TN)  pooled-output tile
    y = jnp.dot(x_ref[...], wt_ref[...], preferred_element_type=jnp.float32)
    y = y + b_ref[...].astype(jnp.float32)
    o_ref[...] = jnp.tanh(y).astype(o_ref.dtype)


def _round_up(a, m):
    return (a + m - 1) // m * m


def _sublane(dtype):
    # Rows per vreg sublane group: 8 for 4-byte, 16 for 2-byte, 32 for 1-byte.
    return {4: 8, 2: 16, 1: 32}.get(jnp.dtype(dtype).itemsize, 8)


def _pick_batch_tile(rows, sub, block_b):
    tb = min(block_b, _round_up(rows, sub))
    # Prefer >= 2 batch steps when the batch allows it (pipelining + more
    # parallel grid work for megacore sharding).
    if rows > sub and pl.cdiv(rows, tb) == 1:
        tb = _round_up(pl.cdiv(rows, 2), sub)
    return tb


def _pick_n_tile(H, itemsize, max_block_bytes=4 << 20):
    """Lane-aligned divisor of H for the output-feature tile.

    Caps the (H, tn) weight slab at `max_block_bytes` (so the resident weight
    fits comfortably in v7x's 64 MiB VMEM and v5e's default scoped VMEM even
    when double-buffered) and, when possible, yields >= 2 N steps so both v7x
    TensorCores have work even for a single batch tile.
    """
    if H % 128 != 0:
        return H  # small / odd hidden size: keep the whole row (full-dim block)
    tn = 128
    for cand in range(128, H + 1, 128):
        if H % cand == 0 and cand * H * itemsize <= max_block_bytes:
            tn = cand
    if tn == H and H >= 256 and (H // 2) % 128 == 0:
        tn = H // 2  # force >= 2 output-feature grid steps
    return tn


def tag_pooler(hidden_states, weight, bias, *, block_b=256):
    """tanh(hidden_states[:, 0] @ weight.T + bias) — TagPooler forward."""
    B, S, H = hidden_states.shape
    out_dtype = hidden_states.dtype
    itemsize = jnp.dtype(out_dtype).itemsize
    sub = _sublane(out_dtype)

    # --- first-token presentation -------------------------------------------
    # Lane-aligned H: pass the (B, S*H) view and let the BlockSpec window at
    # column 0 pull only the first token of each sequence (strided row DMA).
    # Otherwise: slice in the wrapper (only B*H elements) and, for batches
    # smaller than one sublane group, pad a handful of rows.
    fused = (S == 1 or H % 128 == 0) and B >= sub
    if fused:
        x = hidden_states.reshape(B, S * H)   # free dim-merge; no data movement under jit
        rows = B
    else:
        x = hidden_states[:, 0, :]
        rows = B
        if B < sub:
            x = jnp.pad(x, ((0, sub - B), (0, 0)))
            rows = sub

    tb = _pick_batch_tile(rows, sub, block_b)
    tn = _pick_n_tile(H, jnp.dtype(weight.dtype).itemsize)

    # One-time relayout: nn.Linear's (out, in) -> (in, out) so the kernel dot
    # is the canonical MXU contraction; amortized over all grid steps / calls
    # and fused away under jit.
    wt = weight.T
    bias2d = bias.reshape(1, H)

    nb = pl.cdiv(rows, tb)
    nn = pl.cdiv(H, tn)
    grid = (nn, nb)  # batch innermost: the weight slab stays VMEM-resident across it

    cost = pl.CostEstimate(
        flops=2 * B * H * H,
        transcendentals=B * H,
        bytes_accessed=(2 * B * H + H * H + H) * itemsize,
    )

    out = pl.pallas_call(
        _tag_pooler_kernel,
        out_shape=jax.ShapeDtypeStruct((rows, H), out_dtype),
        grid=grid,
        in_specs=[
            # First-token rows: (tb, H) window at column 0.
            pl.BlockSpec((tb, H), lambda j, i: (i, 0)),
            # Weight slab: constant across the inner batch axis -> fetched once
            # per output-feature tile, then resident.
            pl.BlockSpec((H, tn), lambda j, i: (0, j)),
            pl.BlockSpec((1, tn), lambda j, i: (0, j)),
        ],
        out_specs=pl.BlockSpec((tb, tn), lambda j, i: (i, j)),
        compiler_params=pltpu.CompilerParams(
            dimension_semantics=("parallel", "parallel"),
            vmem_limit_bytes=48 * 1024 * 1024,
        ),
        cost_estimate=cost,
    )(x, wt, bias2d)

    return out[:B] if rows != B else out


if __name__ == "__main__":
    def run_case(B, S, H, atol):
        key = jax.random.fold_in(jax.random.PRNGKey(0), H)
        k_h, k_w, k_b = jax.random.split(key, 3)
        hidden_states = jax.random.normal(k_h, (B, S, H), dtype=jnp.float32)
        # Deterministic nn.Linear-style parameters (synthetic, not a checkpoint).
        weight = jax.random.normal(k_w, (H, H), dtype=jnp.float32) * (1.0 / jnp.sqrt(H))
        bias = jax.random.normal(k_b, (H,), dtype=jnp.float32) * 0.01

        out = jax.jit(tag_pooler)(hidden_states, weight, bias)
        jax.block_until_ready(out)

        ref = jnp.tanh(
            jnp.dot(hidden_states[:, 0], weight.T, precision=lax.Precision.HIGHEST)
            + bias
        )
        assert out.shape == (B, H)
        assert jnp.allclose(out, ref, atol=atol, rtol=atol), f"mismatch B={B} S={S} H={H}"

    # Small shape consistent with the module (config.hidden_size = 32).
    run_case(B=2, S=8, H=32, atol=1e-5)
    # Lane-aligned shape: exercises the fused first-token window, the N-tiled
    # resident weight, and a multi-step (parallel, parallel) grid.
    run_case(B=16, S=8, H=256, atol=1e-4)

    print("KERNEL_OK")
</pallas_src>

<mosaic_0001>
module attributes {stable_mosaic.version = 11 : i64} {
  func.func @_tag_pooler_kernel(%arg0: i32, %arg1: i32, %arg2: memref<8x32xf32, #tpu.memory_space<vmem>>, %arg3: memref<32x32xf32, #tpu.memory_space<vmem>>, %arg4: memref<1x32xf32, #tpu.memory_space<vmem>>, %arg5: memref<8x32xf32, #tpu.memory_space<vmem>>) attributes {dimension_semantics = [#tpu.dimension_semantics<parallel>, #tpu.dimension_semantics<parallel>], iteration_bounds = array<i64: 1, 1>, scalar_prefetch = 0 : i64, scratch_operands = 0 : i64, tpu.core_type = #tpu.core_type<tc>, window_params = [{transform_indices = @transform_0, window_bounds = array<i64: 8, 32>}, {transform_indices = @transform_1, window_bounds = array<i64: 32, 32>}, {transform_indices = @transform_2, window_bounds = array<i64: 1, 32>}, {transform_indices = @transform_3, window_bounds = array<i64: 8, 32>}]} {
    %c0 = arith.constant 0 : index
    %c0_0 = arith.constant 0 : index
    %0 = vector.load %arg2[%c0, %c0_0] : memref<8x32xf32, #tpu.memory_space<vmem>>, vector<8x32xf32>
    %c0_1 = arith.constant 0 : index
    %c0_2 = arith.constant 0 : index
    %1 = vector.load %arg3[%c0_1, %c0_2] : memref<32x32xf32, #tpu.memory_space<vmem>>, vector<32x32xf32>
    %cst = arith.constant dense<0.000000e+00> : vector<8x32xf32>
    %2 = tpu.matmul %0, %1, %cst {dimension_numbers = #tpu.dot_dimension_numbers<[1], [0], [0], [1], [0, 0, 1, 1], [], []>} : vector<8x32xf32>, vector<32x32xf32>, vector<8x32xf32> -> vector<8x32xf32>
    %c0_3 = arith.constant 0 : index
    %c0_4 = arith.constant 0 : index
    %3 = vector.load %arg4[%c0_3, %c0_4] : memref<1x32xf32, #tpu.memory_space<vmem>>, vector<1x32xf32>
    %4 = vector.broadcast %3 : vector<1x32xf32> to vector<8x32xf32>
    %5 = arith.addf %2, %4 : vector<8x32xf32>
    %6 = math.tanh %5 : vector<8x32xf32>
    %c0_5 = arith.constant 0 : index
    %c0_6 = arith.constant 0 : index
    %7 = vector.load %arg5[%c0_5, %c0_6] : memref<8x32xf32, #tpu.memory_space<vmem>>, vector<8x32xf32>
    tpu.vector_store %arg5[%c0_5, %c0_6], %6 {strides = array<i32>} : memref<8x32xf32, #tpu.memory_space<vmem>>, vector<8x32xf32>,
    return
  }
  func.func @transform_0(%arg0: i32, %arg1: i32) -> (i32, i32) {
    %c0_i32 = arith.constant 0 : i32
    %c0_i32_0 = arith.constant 0 : i32
    return %arg1, %c0_i32 : i32, i32
  }
  func.func @transform_1(%arg0: i32, %arg1: i32) -> (i32, i32) {
    %c0_i32 = arith.constant 0 : i32
    %c0_i32_0 = arith.constant 0 : i32
    return %c0_i32, %arg0 : i32, i32
  }
  func.func @transform_2(%arg0: i32, %arg1: i32) -> (i32, i32) {
    %c0_i32 = arith.constant 0 : i32
    %c0_i32_0 = arith.constant 0 : i32
    return %c0_i32, %arg0 : i32, i32
  }
  func.func @transform_3(%arg0: i32, %arg1: i32) -> (i32, i32) {
    %c0_i32 = arith.constant 0 : i32
    return %arg1, %arg0 : i32, i32
  }
}

</mosaic_0001>

<bundles_post_ra>
// kernel: tag_pooler.1
= control target key start
LH: loop header
LB: loop body
LE: loop exit
PB: predicated region body
PF: predicated region fallthrough
CT: control target
= control target key end

     0   :  { %v135_v0 = vmov 0.0|0.0   ;;  %vm136_vm0 = vmmov 0   ;;  %v137_v4 = vmov 0.0   ;;  %vm26_vm1 = vcmask 261120   ;;  %s179_s1 = inlined_call_operand.vmem [shape: f32[32,32], index: 1, kind: input, shape index: {}]   ;;  %s180_s0 = inlined_call_operand.vmem [shape: f32[8,32], index: 0, kind: input, shape index: {}]   ;;  %s181_s2 = inlined_call_operand.vmem [shape: f32[1,32], index: 2, kind: input, shape index: {}]   ;;  %s182_s3 = inlined_call_operand.vmem [shape: f32[8,32], index: 3, kind: output, shape index: {}]  }
   0x1   :  { %124 = vmatprep.subr.bf16.mxu0 %v135_v0  ;;  %v15_v1 = vld [vmem:[%s179_s1] sm:$0xff]  ;;  %v16_v2 = vld [vmem:[%s179_s1 + $0x8] sm:$0xff]  ;;  %v17_v3 = vld [vmem:[%s179_s1 + $0x10] sm:$0xff]  ;;  %121 = vmatprep.mubr.msk.f32.mxu0 %vm136_vm0, %v137_v4 }
   0x2   :  { %v125_v5 = vpack.c.bf16 %v16_v2, %v15_v1  ;;  %v18_v6 = vld [vmem:[%s179_s1 + $0x18] sm:$0xff]  ;;  %v14_v8 = vld [vmem:[%s180_s0] sm:$0xff] }
   0x3   :  { %v128_v7 = vpack.c.bf16 %v18_v6, %v17_v3  ;;  %v106_v9 = vld [vmem:[%s181_s2] ss:$0 sm:$0xff] }
   0x4   :  { %126 = vmatpush3.bf16.msra.mxu0 %v125_v5 }
   0x5   :  { %127 = vmatprep.subr.bf16.mxu0 %v135_v0 }
   0x8   :  { %129 = vmatpush3.bf16.msra.mxu0 %v128_v7 }
   0xb   :  { %122 = vmatmul.mubr.msk.f32.vlgmr.msra.gmra.mrb[0].mxu0 %vm26_vm1, %v14_v8 }
  0xde   :  { %v96_v10 = vpop.f32.mrb[0].mxu0 }
  0xdf   :  { %v97_v11 = vadd.f32 %v106_v9, %v96_v10  ;;  %v123_v12 = vpop.f32.mrb[1].mxu0 }
  0xe1   :  { %133 = vtanh.f32 %v97_v11 }
  0xeb   :  { %v134_v13 = vpop.eup %133 }
  0xec   :  { %101 = vst.msk [vmem:[%s182_s3] sm:$0xff] %vm26_vm1, %v134_v13 }

</bundles_post_ra>
